<compile_context>
chip_gen: v6e
topology: v6e:2x2x1
jax: 0.10.0
libtpu: 0.0.40
codegen_flags: <defaults>
</compile_context>

<pallas_src>
import jax
import jax.numpy as jnp
from jax.experimental import pallas as pl
from jax.experimental.pallas import tpu as pltpu

BN_EPS = 1e-5
_LANE = 128


def _round_up(x, m):
    return ((x + m - 1) // m) * m


def _vmem_capacity_bytes():
    """Trace-time VMEM capacity; conservative v7x fallback if unavailable."""
    try:
        return int(pltpu.get_tpu_info().vmem_capacity_bytes)
    except Exception:
        return 64 << 20


def _pick_batch_tile(batch, bytes_per_sample, target_block_bytes):
    """Largest batch tile that (a) divides B exactly (no jnp.pad of x),
    (b) is a multiple of 8 or the whole batch (sublane-friendly output blocks),
    (c) keeps the streamed x block within the byte budget,
    (d) prefers >= 2 grid steps so megacore sharding has work to split."""
    divisors = [d for d in range(1, batch + 1) if batch % d == 0]
    cands = [d for d in divisors if d % 8 == 0 or d == batch]
    fits = [d for d in cands if d * bytes_per_sample <= target_block_bytes]
    multi = [d for d in fits if batch // d >= 2]
    if multi:
        return max(multi)
    if fits:
        return max(fits)
    return min(cands)


def _vmem_limit_bytes(need_bytes):
    """Right-sized scoped-VMEM request: actual buffers + headroom, capped well
    under v7x's 64 MiB/TC so compiler temporaries still fit."""
    need = need_bytes + (4 << 20)
    return int(min(max(need, 8 << 20), 48 << 20))


# ---------------------------------------------------------------------------
# Kernels. x blocks arrive in native NCHW-derived layout (TB, C, HW); the
# spatial mean reduces over the lane axis, producing a lane-dense (TB, C).
# ---------------------------------------------------------------------------

def _gap_bn(x_ref, scale_ref, shift_ref):
    inv_hw = 1.0 / x_ref.shape[-1]
    gf = jnp.sum(x_ref[...], axis=-1, dtype=jnp.float32) * inv_hw   # (TB, C)
    feat = gf * scale_ref[...] + shift_ref[...]                     # folded BN
    return gf, feat


def _head_train_kernel(x_ref, scale_ref, shift_ref, w_ref, cls_ref, gf_ref):
    """GAP -> folded BN -> Linear classifier. Stores cls_score and global_feat."""
    gf, feat = _gap_bn(x_ref, scale_ref, shift_ref)
    cls_ref[...] = jnp.dot(feat.astype(w_ref.dtype), w_ref[...],
                           preferred_element_type=jnp.float32)      # MXU
    gf_ref[...] = gf


def _head_eval_feat_kernel(x_ref, scale_ref, shift_ref, feat_ref):
    """GAP -> folded BN. Stores only the post-bnneck embedding."""
    _, feat = _gap_bn(x_ref, scale_ref, shift_ref)
    feat_ref[...] = feat


def _head_eval_gf_kernel(x_ref, gf_ref):
    """GAP only. Stores only the pre-bnneck global feature."""
    inv_hw = 1.0 / x_ref.shape[-1]
    gf_ref[...] = jnp.sum(x_ref[...], axis=-1, dtype=jnp.float32) * inv_hw


# ---------------------------------------------------------------------------
# Wrapper
# ---------------------------------------------------------------------------

def baseline_head(x_nchw, params, *, mode="eval_feat", target_block_bytes=None):
    """Runs the fused head. mode in {"train", "eval_feat", "eval_gf"}."""
    B, C, H, W = x_nchw.shape
    HW = H * W

    # Free reshape: keep native NCHW layout and dtype (no transpose, no cast).
    x = x_nchw.reshape(B, C, HW)

    bytes_per_sample = C * HW * x.dtype.itemsize
    if target_block_bytes is None:
        target_block_bytes = min(16 << 20, _vmem_capacity_bytes() // 8)
    tb = _pick_batch_tile(B, bytes_per_sample, target_block_bytes)
    grid = (B // tb,)
    x_block_bytes = tb * bytes_per_sample

    x_spec = pl.BlockSpec((tb, C, HW), lambda i: (i, 0, 0))
    vec_spec = pl.BlockSpec((1, C), lambda i: (0, 0))
    row_spec = pl.BlockSpec((tb, C), lambda i: (i, 0))

    # Fold BatchNorm1d (running stats + affine) into scale / shift.
    scale = (params["bn_gamma"] *
             jax.lax.rsqrt(params["bn_var"] + BN_EPS)).astype(jnp.float32)
    shift = (params["bn_beta"] - params["bn_mean"] * scale).astype(jnp.float32)

    if mode == "train":
        # TODO(synk): training-mode BatchNorm1d batch statistics are not
        # modelled; folded running (inference) statistics are used instead.
        w = params["w_cls"]                                   # (C, num_classes)
        num_classes = w.shape[1]
        n_pad = _round_up(num_classes, _LANE)
        if n_pad != num_classes:
            w = jnp.pad(w, ((0, 0), (0, n_pad - num_classes)))
        need = (2 * x_block_bytes
                + 2 * (tb * C * 4 + tb * n_pad * 4)
                + C * n_pad * w.dtype.itemsize + 2 * C * 4)
        cls, gf = pl.pallas_call(
            _head_train_kernel,
            out_shape=(
                jax.ShapeDtypeStruct((B, n_pad), jnp.float32),   # cls (padded)
                jax.ShapeDtypeStruct((B, C), jnp.float32),       # global_feat
            ),
            grid=grid,
            in_specs=[x_spec, vec_spec, vec_spec,
                      pl.BlockSpec((C, n_pad), lambda i: (0, 0))],
            out_specs=(pl.BlockSpec((tb, n_pad), lambda i: (i, 0)), row_spec),
            compiler_params=pltpu.CompilerParams(
                dimension_semantics=("parallel",),
                vmem_limit_bytes=_vmem_limit_bytes(need)),
        )(x, scale, shift, w)
        return cls[:, :num_classes], gf

    if mode == "eval_feat":
        need = 2 * x_block_bytes + 2 * tb * C * 4 + 2 * C * 4
        feat = pl.pallas_call(
            _head_eval_feat_kernel,
            out_shape=jax.ShapeDtypeStruct((B, C), jnp.float32),
            grid=grid,
            in_specs=[x_spec, vec_spec, vec_spec],
            out_specs=row_spec,
            compiler_params=pltpu.CompilerParams(
                dimension_semantics=("parallel",),
                vmem_limit_bytes=_vmem_limit_bytes(need)),
        )(x, scale, shift)
        return feat

    # mode == "eval_gf"
    need = 2 * x_block_bytes + 2 * tb * C * 4
    gf = pl.pallas_call(
        _head_eval_gf_kernel,
        out_shape=jax.ShapeDtypeStruct((B, C), jnp.float32),
        grid=grid,
        in_specs=[x_spec],
        out_specs=row_spec,
        compiler_params=pltpu.CompilerParams(
            dimension_semantics=("parallel",),
            vmem_limit_bytes=_vmem_limit_bytes(need)),
    )(x)
    return gf


def baseline_forward(x, params, *, training=False, if_flip_feat=True,
                     neck="bnneck", neck_feat="after"):
    """Mirrors Baseline.forward / Baseline.__forward semantics (bnneck config)."""
    # TODO(synk): only the neck='bnneck' configuration (the module's default)
    # is fused; the no-neck Linear-with-bias classifier path is not implemented.
    if training:
        cls_score, global_feat = baseline_head(x, params, mode="train")
        return cls_score, global_feat

    if neck == "bnneck" and neck_feat == "after":
        out = baseline_head(x, params, mode="eval_feat")
    else:
        # neck_feat == 'before' (or no neck): embedding is the pre-BN feature.
        out = baseline_head(x, params, mode="eval_gf")

    if if_flip_feat:
        # TODO(synk): with a real ResNet backbone the horizontal flip must be
        # applied before the backbone. Here base == identity and the head
        # starts with a spatial global-average-pool (flip-invariant), so
        # feat(flip(x)) == feat(x) and feat2 + feat1 == 2 * feat(x); the second
        # head pass (and the jnp.flip HBM copy) is elided.
        return out + out
    return out


def make_params(key, feat_dim, num_classes):
    """Deterministic parameter init matching the module's __init__ (bnneck)."""
    # bottleneck = BatchNorm1d(feat_dim); weights_init_kaiming -> gamma=1, beta=0;
    # running stats are PyTorch defaults (mean=0, var=1).
    bn_gamma = jnp.ones((1, feat_dim), jnp.float32)
    bn_beta = jnp.zeros((1, feat_dim), jnp.float32)
    bn_mean = jnp.zeros((1, feat_dim), jnp.float32)
    bn_var = jnp.ones((1, feat_dim), jnp.float32)
    # classifier = Linear(feat_dim, num_classes, bias=False);
    # weights_init_classifier -> normal(std=0.001). Stored transposed (C, ncls).
    w_cls = 0.001 * jax.random.normal(key, (feat_dim, num_classes), jnp.float32)
    return {
        "bn_gamma": bn_gamma,
        "bn_beta": bn_beta,
        "bn_mean": bn_mean,
        "bn_var": bn_var,
        "w_cls": w_cls,
    }


def _reference_head(x_nchw, params):
    """Pure-JAX reference (f32) for correctness checking."""
    B, C, H, W = x_nchw.shape
    gf = jnp.mean(x_nchw.reshape(B, C, H * W), axis=-1)
    inv_std = jax.lax.rsqrt(params["bn_var"] + BN_EPS)
    feat = (gf - params["bn_mean"]) * inv_std * params["bn_gamma"] + params["bn_beta"]
    cls = feat @ params["w_cls"]
    return gf, feat, cls


if __name__ == "__main__":
    key = jax.random.PRNGKey(0)
    k_x, k_w = jax.random.split(key)

    B, FEAT_DIM, H, W = 2, 32, 16, 16
    NUM_CLASSES = 8

    x = jax.random.normal(k_x, (B, FEAT_DIM, H, W), jnp.float32)
    params = make_params(k_w, FEAT_DIM, NUM_CLASSES)

    # Eval path with flip-feature (feat2 + feat1), neck='bnneck', neck_feat='after'.
    out_eval = baseline_forward(x, params, training=False,
                                if_flip_feat=True, neck="bnneck",
                                neck_feat="after")
    out_eval = jax.block_until_ready(out_eval)
    assert out_eval.shape == (B, FEAT_DIM)

    # Training path (returns (cls_score, global_feat)).
    cls_score, global_feat = baseline_forward(x, params, training=True)
    jax.block_until_ready(cls_score)
    jax.block_until_ready(global_feat)
    assert cls_score.shape == (B, NUM_CLASSES)
    assert global_feat.shape == (B, FEAT_DIM)

    # Eval with neck_feat='before' (returns pre-BN global feature).
    out_before = baseline_forward(x, params, training=False,
                                  if_flip_feat=False, neck="bnneck",
                                  neck_feat="before")
    out_before = jax.block_until_ready(out_before)
    assert out_before.shape == (B, FEAT_DIM)

    # Correctness vs pure-JAX reference (f32 path -> tight; matmul slightly looser).
    gf_ref, feat_ref, cls_ref = _reference_head(x, params)
    assert jnp.allclose(global_feat, gf_ref, rtol=1e-5, atol=1e-5)
    assert jnp.allclose(out_before, gf_ref, rtol=1e-5, atol=1e-5)
    assert jnp.allclose(out_eval, 2.0 * feat_ref, rtol=1e-5, atol=1e-5)
    assert jnp.allclose(cls_score, cls_ref, rtol=2e-2, atol=1e-5)

    print("KERNEL_OK")
</pallas_src>

<mosaic_0001>
module attributes {stable_mosaic.version = 11 : i64} {
  func.func @_head_eval_feat_kernel(%arg0: i32, %arg1: memref<2x32x256xf32, #tpu.memory_space<vmem>>, %arg2: memref<1x32xf32, #tpu.memory_space<vmem>>, %arg3: memref<1x32xf32, #tpu.memory_space<vmem>>, %arg4: memref<2x32xf32, #tpu.memory_space<vmem>>) attributes {dimension_semantics = [#tpu.dimension_semantics<parallel>], iteration_bounds = array<i64: 1>, scalar_prefetch = 0 : i64, scratch_operands = 0 : i64, tpu.core_type = #tpu.core_type<tc>, window_params = [{transform_indices = @transform_0, window_bounds = array<i64: 2, 32, 256>}, {pipeline_mode = #tpu.pipeline_mode<synchronous>, transform_indices = @transform_1, window_bounds = array<i64: 1, 32>}, {pipeline_mode = #tpu.pipeline_mode<synchronous>, transform_indices = @transform_2, window_bounds = array<i64: 1, 32>}, {transform_indices = @transform_3, window_bounds = array<i64: 2, 32>}]} {
    %c0 = arith.constant 0 : index
    %c0_0 = arith.constant 0 : index
    %c0_1 = arith.constant 0 : index
    %0 = vector.load %arg1[%c0, %c0_0, %c0_1] : memref<2x32x256xf32, #tpu.memory_space<vmem>>, vector<2x32x256xf32>
    %cst = arith.constant dense<0.000000e+00> : vector<2x32xf32>
    %1 = vector.multi_reduction <add>, %0, %cst [2] : vector<2x32x256xf32> to vector<2x32xf32>
    %cst_2 = arith.constant 3.906250e-03 : f32
    %2 = vector.broadcast %cst_2 : f32 to vector<2x32xf32>
    %3 = arith.mulf %1, %2 : vector<2x32xf32>
    %c0_3 = arith.constant 0 : index
    %c0_4 = arith.constant 0 : index
    %4 = vector.load %arg2[%c0_3, %c0_4] : memref<1x32xf32, #tpu.memory_space<vmem>>, vector<1x32xf32>
    %5 = vector.broadcast %4 : vector<1x32xf32> to vector<2x32xf32>
    %6 = arith.mulf %3, %5 : vector<2x32xf32>
    %c0_5 = arith.constant 0 : index
    %c0_6 = arith.constant 0 : index
    %7 = vector.load %arg3[%c0_5, %c0_6] : memref<1x32xf32, #tpu.memory_space<vmem>>, vector<1x32xf32>
    %8 = vector.broadcast %7 : vector<1x32xf32> to vector<2x32xf32>
    %9 = arith.addf %6, %8 : vector<2x32xf32>
    %c0_7 = arith.constant 0 : index
    %c0_8 = arith.constant 0 : index
    %10 = vector.load %arg4[%c0_7, %c0_8] : memref<2x32xf32, #tpu.memory_space<vmem>>, vector<2x32xf32>
    tpu.vector_store %arg4[%c0_7, %c0_8], %9 {strides = array<i32>} : memref<2x32xf32, #tpu.memory_space<vmem>>, vector<2x32xf32>,
    return
  }
  func.func @transform_0(%arg0: i32) -> (i32, i32, i32) {
    %c0_i32 = arith.constant 0 : i32
    %c0_i32_0 = arith.constant 0 : i32
    %c0_i32_1 = arith.constant 0 : i32
    return %arg0, %c0_i32, %c0_i32_0 : i32, i32, i32
  }
  func.func @transform_1(%arg0: i32) -> (i32, i32) {
    %c0_i32 = arith.constant 0 : i32
    %c0_i32_0 = arith.constant 0 : i32
    %c0_i32_1 = arith.constant 0 : i32
    return %c0_i32, %c0_i32_0 : i32, i32
  }
  func.func @transform_2(%arg0: i32) -> (i32, i32) {
    %c0_i32 = arith.constant 0 : i32
    %c0_i32_0 = arith.constant 0 : i32
    %c0_i32_1 = arith.constant 0 : i32
    return %c0_i32, %c0_i32_0 : i32, i32
  }
  func.func @transform_3(%arg0: i32) -> (i32, i32) {
    %c0_i32 = arith.constant 0 : i32
    %c0_i32_0 = arith.constant 0 : i32
    return %arg0, %c0_i32 : i32, i32
  }
}

</mosaic_0001>

<bundles_post_ra>
// kernel: tpu_custom_call.1
= control target key start
LH: loop header
LB: loop body
LE: loop exit
PB: predicated region body
PF: predicated region fallthrough
CT: control target
= control target key end

     0   :  { %8 = vsyncpa [#allocation3], 0  ;;  %s331_s0 = inlined_call_operand.hbm [shape: f32[2,32,256], index: 0, kind: input, shape index: {}]   ;;  %s332_s1 = inlined_call_operand.vmem [shape: f32[1,32], index: 1, kind: input, shape index: {}]   ;;  %s333_s2 = inlined_call_operand.vmem [shape: f32[1,32], index: 2, kind: input, shape index: {}]   ;;  %s334_s3 = inlined_call_operand.hbm [shape: f32[2,32], index: 3, kind: output, shape index: {}]  }
   0x1   :  { %9 = vsyncpa [#allocation4], 0  ;;  %s294_s12 = smov [#allocation2]  }
   0x2   :  { %s15_s13 = sshll.u32 %s294_s12, 4  ;;  %s16_s13 = int_to_ptr.vmem [resolvable:$true] %s15_s13 }
   0x3   :  { %s258_s14 = scalar_lea.vmem %s16_s13, 2048  ;;  %p263_p1 = scmp.lt.s32.totalorder %s16_s13, %s16_s13 }
   0x4   :  { %p259_p0 = scmp.ne.s32.totalorder %s16_s13, %s258_s14  ;;  %p264_p2 = scmp.lt.s32.totalorder %s258_s14, %s258_s14 }
   0x6   :  { %p265_p3 = por %p264_p2, %p263_p1 }
   0x8   :  { %p266_p4 = pnand %p265_p3, %p259_p0 }
   0xa   :  { %269 = shalt.err (!%p266_p4)
}
   0xb   :  { %s295_s15 = smov 256   ;;  %s296_s16 = smov 16  }
   0xc   :  { %21 = dma.hbm_to_vmem [thread:$0]  %s331_s0, 2048, %s16_s13, [#allocation3], %s295_s15, %s295_s15, %s296_s16  }
   0xd   :  { %290 = dma.done.wait [#allocation3], 2048  }
   0xe   :  { %291 = vsyncadd [#allocation3], 4294965248  ;;  %v37_v0 = vld [vmem:[#allocation2 + $0x40] sm:$0xff]  ;;  %v38_v1 = vld [vmem:[#allocation2 + $0x48] sm:$0xff]  ;;  %v297_v25 = vmov 0   ;;  %vm186_vm0 = vcmask 130112  }
   0xf   :  { %v29_v2 = vld [vmem:[#allocation2] sm:$0xff]  ;;  %v57_v3 = vadd.f32 %v38_v1, %v37_v0  ;;  %v30_v4 = vld [vmem:[#allocation2 + $0x8] sm:$0xff]  ;;  %v39_v5 = vld [vmem:[#allocation2 + $0x50] sm:$0xff]  ;;  %248 = vset.pattern.permute.xlu0 %v297_v25  ;;  %249 = vset.pattern.permute.xlu1 %v297_v25  ;;  %vm193_vm1 = vcmask 195712   ;;  %vm200_vm2 = vcmask 261312   ;;  %vm221_vm3 = vcmask 1041409  }
  0x10   :  { %v40_v6 = vld [vmem:[#allocation2 + $0x58] sm:$0xff]  ;;  %v45_v7 = vadd.f32 %v30_v4, %v29_v2  ;;  %v31_v8 = vld [vmem:[#allocation2 + $0x10] sm:$0xff]  ;;  %v41_v12 = vld [vmem:[#allocation2 + $0x60] sm:$0xff]  ;;  %vm224_vm4 = vcmask 254976  }
  0x11   :  { %v32_v9 = vld [vmem:[#allocation2 + $0x18] sm:$0xff]  ;;  %58 = vadd.xlane.f32.xlu1 %v57_v3  ;;  %v60_v10 = vadd.f32 %v40_v6, %v39_v5  ;;  %v42_v13 = vld [vmem:[#allocation2 + $0x68] sm:$0xff]  ;;  %v33_v14 = vld [vmem:[#allocation2 + $0x20] sm:$0xff]  ;;  %v175_v3 = vlaneseq }
  0x12   :  { %46 = vadd.xlane.f32.xlu0 %v45_v7  ;;  %v48_v11 = vadd.f32 %v32_v9, %v31_v8  ;;  %v34_v15 = vld [vmem:[#allocation2 + $0x28] sm:$0xff]  ;;  %v63_v16 = vadd.f32 %v42_v13, %v41_v12  ;;  %v43_v18 = vld [vmem:[#allocation2 + $0x70] sm:$0xff]  ;;  %v44_v19 = vld [vmem:[#allocation2 + $0x78] sm:$0xff] }
  0x13   :  { %v51_v17 = vadd.f32 %v34_v15, %v33_v14  ;;  %v35_v20 = vld [vmem:[#allocation2 + $0x30] sm:$0xff]  ;;  %v36_v21 = vld [vmem:[#allocation2 + $0x38] sm:$0xff]  ;;  %v66_v22 = vadd.f32 %v44_v19, %v43_v18  ;;  %v241_v24 = vld [vmem:[%s332_s1] ss:$0 sm:$0xff]  ;;  %v176_v5 = vand.u32 127, %v175_v3  ;;  %v178_v8 = vshrl.u32 %v175_v3, 7 }
  0x14   :  { %v54_v23 = vadd.f32 %v36_v21, %v35_v20  ;;  %v242_v26 = vld [vmem:[%s333_s2] ss:$0 sm:$0xff]  ;;  %s298_s1 = smov [#allocation5]  }
  0x15   :  { %61 = vadd.xlane.f32.xlu1 %v60_v10  ;;  %v181_v9 = vadd.s32 4294967288, %v176_v5  ;;  %v188_v10 = vadd.s32 4294967280, %v176_v5  ;;  %v179_v14 = vsub.s32 %v176_v5, %v178_v8  ;;  %s232_s2 = sshll.u32 %s298_s1, 4  ;;  %s233_s2 = int_to_ptr.vmem [resolvable:$true] %s232_s2 }
  0x16   :  { %49 = vadd.xlane.f32.xlu0 %v48_v11  ;;  %v195_v11 = vadd.s32 4294967272, %v176_v5  ;;  %s270_s22 = scalar_lea.vmem %s233_s2, 32  ;;  %p275_p6 = scmp.lt.s32.totalorder %s233_s2, %s233_s2 }
  0x17   :  { %v184_v15 = vsub.s32 %v181_v9, %v178_v8  ;;  %p271_p5 = scmp.ne.s32.totalorder %s233_s2, %s270_s22  ;;  %p276_p7 = scmp.lt.s32.totalorder %s270_s22, %s270_s22 }
  0x18   :  { %v198_v18 = vsub.s32 %v195_v11, %v178_v8 }
  0x19   :  { %64 = vadd.xlane.f32.xlu1 %v63_v16  ;;  %v191_v16 = vsub.s32 %v188_v10, %v178_v8  ;;  %p277_p8 = por %p276_p7, %p275_p6 }
  0x1a   :  { %52 = vadd.xlane.f32.xlu0 %v51_v17 }
  0x1b   :  { %p278_p9 = pnand %p277_p8, %p271_p5 }
  0x1d   :  { %67 = vadd.xlane.f32.xlu1 %v66_v22 }
  0x1e   :  { %55 = vadd.xlane.f32.xlu0 %v54_v23 }
  0x2e   :  { %88 = vbcast.lane.b32.xlu1 %v241_v24, 264 }
  0x32   :  { %92 = vbcast.lane.b32.xlu1 %v241_v24, 272 }
  0x34   :  { %84 = vbcast.lane.b32.xlu0 %v241_v24, 256 }
  0x36   :  { %96 = vbcast.lane.b32.xlu1 %v241_v24, 280 }
  0x38   :  { %117 = vbcast.lane.b32.xlu0 %v242_v26, 256 }
  0x3a   :  { %121 = vbcast.lane.b32.xlu1 %v242_v26, 264 }
  0x3c   :  { %125 = vbcast.lane.b32.xlu0 %v242_v26, 272 }
  0x3e   :  { %129 = vbcast.lane.b32.xlu1 %v242_v26, 280 }
  0x9a   :  { %v59_v27 = vpop.xlane.xlu1 %58 }
  0x9b   :  { %v47_v28 = vpop.xlane.xlu0 %46  ;;  %v73_v48 = vmul.f32 0.00390625, %v59_v27 }
  0x9c   :  { %v69_v37 = vmul.f32 0.00390625, %v47_v28 }
  0x9e   :  { %v62_v29 = vpop.xlane.xlu1 %61 }
  0x9f   :  { %v50_v30 = vpop.xlane.xlu0 %49  ;;  %v74_v43 = vmul.f32 0.00390625, %v62_v29 }
  0xa0   :  { %v70_v44 = vmul.f32 0.00390625, %v50_v30 }
  0xa2   :  { %v65_v31 = vpop.xlane.xlu1 %64 }
  0xa3   :  { %v53_v32 = vpop.xlane.xlu0 %52  ;;  %v75_v49 = vmul.f32 0.00390625, %v65_v31 }
  0xa4   :  { %v71_v55 = vmul.f32 0.00390625, %v53_v32 }
  0xa6   :  { %v68_v33 = vpop.xlane.xlu1 %67 }
  0xa7   :  { %v56_v34 = vpop.xlane.xlu0 %55  ;;  %v76_v56 = vmul.f32 0.00390625, %v68_v33 }
  0xa8   :  { %v72_v62 = vmul.f32 0.00390625, %v56_v34 }
  0xaa   :  { %v89_v35 = vpop.permute.xlu1 %88 }
  0xab   :  { %v85_v36 = vpop.permute.xlu0 %84  ;;  %v103_v45 = vmul.f32 %v89_v35, %v70_v44  ;;  %v107_v46 = vmul.f32 %v89_v35, %v74_v43 }
  0xac   :  { %v102_v38 = vmul.f32 %v85_v36, %v69_v37  ;;  %v106_v53 = vmul.f32 %v85_v36, %v73_v48 }
  0xae   :  { %v93_v39 = vpop.permute.xlu1 %92 }
  0xaf   :  { %v118_v40 = vpop.permute.xlu0 %117  ;;  %v108_v54 = vmul.f32 %v93_v39, %v75_v49  ;;  %v104_v60 = vmul.f32 %v93_v39, %v71_v55 }
  0xb0   :  { %v135_v41 = vadd.f32 %v118_v40, %v102_v38  ;;  %v139_v57 = vadd.f32 %v118_v40, %v106_v53 }
  0xb2   :  { %152 = vperm.xlu0 %248, %v135_v41   ;;  %v97_v42 = vpop.permute.xlu1 %96 }
  0xb3   :  { %v126_v52 = vpop.permute.xlu0 %125  ;;  %v109_v61 = vmul.f32 %v97_v42, %v76_v56  ;;  %v105_v1 = vmul.f32 %v97_v42, %v72_v62 }
  0xb4   :  { %v141_v58 = vadd.f32 %v126_v52, %v108_v54  ;;  %v137_v63 = vadd.f32 %v126_v52, %v104_v60 }
  0xb6   :  { %v122_v47 = vpop.permute.xlu1 %121 }
  0xb7   :  { %v136_v50 = vadd.f32 %v122_v47, %v103_v45  ;;  %v140_v51 = vadd.f32 %v122_v47, %v107_v46 }
  0xb9   :  { %155 = vperm.xlu1 %249, %v136_v50   ;;  %167 = vperm.xlu0 %248, %v140_v51  }
  0xba   :  { %v130_v59 = vpop.permute.xlu1 %129 }
  0xbb   :  { %v142_v0 = vadd.f32 %v130_v59, %v109_v61  ;;  %v138_v2 = vadd.f32 %v130_v59, %v105_v1 }
  0xbd   :  { %164 = vperm.xlu1 %249, %v139_v57   ;;  %170 = vperm.xlu0 %248, %v141_v58  }
  0xc1   :  { %173 = vperm.xlu0 %248, %v142_v0   ;;  %158 = vperm.xlu1 %249, %v137_v63  }
  0xc5   :  { %161 = vperm.xlu1 %249, %v138_v2  }
 0x12d   :  { %v153_v4 = vpop.permute.xlu0 %152 }
 0x12e   :  { %v180_v25 = vrot.slane %v153_v4, %v179_v14 }
 0x134   :  { %v156_v6 = vpop.permute.xlu1 %155  ;;  %v168_v7 = vpop.permute.xlu0 %167 }
 0x135   :  { %v185_v21 = vrot.slane %v156_v6, %v184_v15  ;;  %v209_v22 = vrot.slane %v168_v7, %v184_v15 }
 0x137   :  { %v187_v29 = vsel %vm186_vm0, %v185_v21, %v180_v25 }
 0x138   :  { %v165_v12 = vpop.permute.xlu1 %164  ;;  %v171_v13 = vpop.permute.xlu0 %170 }
 0x139   :  { %v205_v17 = vrot.slane %v165_v12, %v179_v14  ;;  %v214_v23 = vrot.slane %v171_v13, %v191_v16 }
 0x13b   :  { %v210_v26 = vsel %vm186_vm0, %v209_v22, %v205_v17 }
 0x13c   :  { %v159_v19 = vpop.permute.xlu1 %158  ;;  %v174_v20 = vpop.permute.xlu0 %173  ;;  %v215_v31 = vsel %vm193_vm1, %v214_v23, %v210_v26 }
 0x13d   :  { %v192_v24 = vrot.slane %v159_v19, %v191_v16  ;;  %v219_v27 = vrot.slane %v174_v20, %v198_v18 }
 0x13f   :  { %v194_v32 = vsel %vm193_vm1, %v192_v24, %v187_v29  ;;  %v220_v33 = vsel %vm200_vm2, %v219_v27, %v215_v31 }
 0x140   :  { %v162_v28 = vpop.permute.xlu1 %161 }
 0x141   :  { %v199_v30 = vrot.slane %v162_v28, %v198_v18 }
 0x143   :  { %v201_v34 = vsel %vm200_vm2, %v199_v30, %v194_v32 }
 0x144   :  { %v222_v35 = vsel %vm221_vm3, %v220_v33, %v201_v34 }
 0x145   :  { %225 = vst.msk [vmem:[#allocation5] sm:$0x3] %vm224_vm4, %v222_v35 }
 0x146   :  { %281 = shalt.err (!%p278_p9)
}
 0x147   :  { %235 = dma.vmem_to_hbm [thread:$0]  %s233_s2, 32, %s334_s3, [#allocation4]  }
 0x148   :  { %292 = dma.done.wait [#allocation4], 32  }
 0x149   :  { %293 = vsyncadd [#allocation4], 4294967264 }
 0x14a   :  { %239 = vsyncpa [#allocation3], 1 }
 0x14b   :  { %240 = vsyncpa [#allocation4], 1 }

</bundles_post_ra>
